<compile_context>
chip_gen: v6e
topology: v6e:2x2x1
jax: 0.10.0
libtpu: 0.0.40
codegen_flags: <defaults>
</compile_context>

<pallas_src>
import jax
import jax.numpy as jnp
from jax.experimental import pallas as pl
from jax.experimental.pallas import tpu as pltpu

EPS = 1e-6


def _round_up(n, m):
    return ((n + m - 1) // m) * m


def _decoder_norm_kernel(x_ref, alpha_ref, bias_ref, o_ref):
    """Custom LayerNormalization hot path on one (B, TS, D) slab.

    x_ref:     (B, TS, D) tile in VMEM
    alpha_ref: (1,) scalar param in SMEM
    bias_ref:  (1,) scalar param in SMEM
    o_ref:     (B, TS, D) tile in VMEM
    """
    # Scalars from SMEM first (scalar path / sregs).
    alpha = alpha_ref[0]
    bias = bias_ref[0]

    x = x_ref[...].astype(jnp.float32)
    b = x.shape[0]

    # Mean over the last (feature) dim, keepdim — XLU cross-lane reduce.
    mean = jnp.mean(x, axis=-1, keepdims=True)                  # (B, TS, 1)

    # torch.std(dim=0, keepdim=True): unbiased (ddof=1) over the *batch* dimension.
    # Two-pass form (x is already resident in VMEM): no catastrophic cancellation,
    # and the extra VPU ops are free filler in this HBM-bound kernel.
    mu_b = jnp.mean(x, axis=0, keepdims=True)                   # (1, TS, D)
    dev = x - mu_b
    var_b = jnp.sum(dev * dev, axis=0, keepdims=True) * (1.0 / (b - 1))
    std_b = jnp.sqrt(var_b)                                     # (1, TS, D)

    # Exact reciprocal on the (1, TS, D) stat slab (B x fewer EUP ops than a full-block
    # divide); fold alpha into the scale so the per-element path is sub + mul + add.
    inv = 1.0 / (std_b + EPS)                                   # (1, TS, D)
    scale = alpha * inv

    o_ref[...] = ((x - mean) * scale + bias).astype(o_ref.dtype)


def _choose_seq_tile(B, S, D, itemsize, *, budget_bytes=2 << 20, min_steps=2):
    """Pick a sequence tile TS for the (B, TS, D) block.

    Rules:
      * TS is a multiple of the sublane count (or == S for very short sequences), so
        the BlockSpec satisfies the (8,128) layout constraint; partial edge blocks are
        handled by grid = cdiv(S, TS).
      * One (B, TS, D) I/O block stays under ~budget_bytes (bf16/f32 aware), keeping
        double-buffered in+out plus the in-kernel f32 temporaries comfortably inside
        scoped VMEM on every chip (v7x's 64 MiB included).
      * The seq grid gets >= min_steps steps when S allows, so the "parallel" axis can
        be sharded across both TensorCores on v7x.
    """
    sublane = 8 if itemsize >= 4 else (16 if itemsize == 2 else 32)
    if S <= sublane:
        return S                       # single short block: block dim == full array dim

    row_bytes = B * D * itemsize       # bytes of one seq row of the block
    # Largest sublane-aligned tile whose I/O block fits the budget.
    ts_budget = max(sublane, (budget_bytes // row_bytes) // sublane * sublane)
    # Cap so the grid has >= min_steps steps (megacore on v7x; harmless elsewhere).
    ts_steps = _round_up(pl.cdiv(S, min_steps), sublane)
    ts = min(ts_budget, ts_steps)
    return min(ts, _round_up(S, sublane))


def layer_normalization(x, alpha, bias, *, seq_tile=None, vmem_limit_bytes=None):
    """Pallas call wrapping the custom LayerNormalization, tiled over the seq axis."""
    B, S, D = x.shape
    itemsize = jnp.dtype(x.dtype).itemsize
    sublane = 8 if itemsize >= 4 else (16 if itemsize == 2 else 32)

    if seq_tile is not None:
        ts = min(seq_tile, S)
        if ts != S and ts % sublane != 0:       # keep the (8,128) block constraint
            ts = min(_round_up(ts, sublane), S)
    else:
        ts = _choose_seq_tile(B, S, D, itemsize)

    grid = (pl.cdiv(S, ts),)                    # partial edge block handled by masking

    # Scoped-VMEM budget derived from the actual block: double-buffered input + output
    # plus ~4 full-block f32 temporaries (upcast, deviations, ...), with slack, clamped
    # well under v7x's 64 MiB physical VMEM.
    if vmem_limit_bytes is None:
        block_io = B * ts * D * itemsize
        f32_block = B * ts * D * 4
        vmem_limit_bytes = 2 * 2 * block_io + 4 * f32_block + (1 << 20)
        vmem_limit_bytes = max(min(vmem_limit_bytes, 48 << 20), 16 << 20)

    # TODO(synk): for extremely large B*D (a single (B, 8, D) slab over ~32 MiB) tile
    # the batch axis as well, accumulating the batch stats over an "arbitrary" B grid
    # axis into a (1, ts, D) VMEM scratch; not needed for transformer-sized d_model.
    return pl.pallas_call(
        _decoder_norm_kernel,
        out_shape=jax.ShapeDtypeStruct(x.shape, x.dtype),
        grid=grid,
        in_specs=[
            pl.BlockSpec((B, ts, D), lambda s: (0, s, 0)),              # x tile (VMEM)
            pl.BlockSpec(memory_space=pltpu.MemorySpace.SMEM),          # alpha (1,)
            pl.BlockSpec(memory_space=pltpu.MemorySpace.SMEM),          # bias  (1,)
        ],
        out_specs=pl.BlockSpec((B, ts, D), lambda s: (0, s, 0)),
        compiler_params=pltpu.CompilerParams(
            dimension_semantics=("parallel",),   # independent seq slabs (megacore on v7x)
            vmem_limit_bytes=vmem_limit_bytes,
        ),
    )(x, alpha, bias)


def decoder_forward(params, layers, x, encoder_output, src_msk, tgt_msk, *, seq_tile=None):
    """Decoder.forward: run the layer stack, then the custom LayerNormalization."""
    # TODO(synk): the decoder layer blocks are not defined in model.py (the nn.ModuleList
    # is injected); `layers` is a sequence of user-supplied callables with signature
    # (x, encoder_output, src_msk, tgt_msk) -> x (empty in the demo).
    for layer in layers:
        x = layer(x, encoder_output, src_msk, tgt_msk)
    return layer_normalization(x, params["alpha"], params["bias"], seq_tile=seq_tile)


def _reference_norm(x, alpha, bias):
    mean = jnp.mean(x, axis=-1, keepdims=True)
    std = jnp.std(x, axis=0, keepdims=True, ddof=1)   # torch.std default: unbiased
    return alpha * (x - mean) / (std + EPS) + bias


if __name__ == "__main__":
    key = jax.random.PRNGKey(0)
    kx, ke = jax.random.split(key)

    # Lane-dense shapes: D is a multiple of 128, seq a multiple of 8 (f32).
    B, S, D = 2, 16, 128
    x = jax.random.normal(kx, (B, S, D), dtype=jnp.float32)
    encoder_output = jax.random.normal(ke, (B, S, D), dtype=jnp.float32)
    src_msk = jnp.ones((B, 1, 1, S), dtype=jnp.float32)
    tgt_msk = jnp.ones((B, 1, S, S), dtype=jnp.float32)

    # Parameters exactly as in LayerNormalization.__init__ (deterministic).
    params = {
        "alpha": jnp.ones((1,), dtype=jnp.float32),
        "bias": jnp.zeros((1,), dtype=jnp.float32),
    }
    layers = []  # injected decoder blocks (none supplied here)

    # Auto tiling picks ts=8 here -> 2 grid steps, exercising the tiled/pipelined path.
    out = decoder_forward(params, layers, x, encoder_output, src_msk, tgt_msk)
    out = jax.block_until_ready(out)

    ref = _reference_norm(x, params["alpha"], params["bias"])
    assert out.shape == x.shape and out.dtype == x.dtype
    # Exact two-pass stats + exact reciprocal -> near-f32 agreement with the reference.
    assert jnp.allclose(out, ref, atol=1e-3, rtol=1e-3), "mismatch vs reference"

    print("KERNEL_OK")
</pallas_src>

<mosaic_0001>
module attributes {stable_mosaic.version = 11 : i64} {
  func.func @_decoder_norm_kernel(%arg0: i32, %arg1: memref<2x8x128xf32, #tpu.memory_space<vmem>>, %arg2: memref<1xf32, #tpu.memory_space<smem>>, %arg3: memref<1xf32, #tpu.memory_space<smem>>, %arg4: memref<2x8x128xf32, #tpu.memory_space<vmem>>) attributes {dimension_semantics = [#tpu.dimension_semantics<parallel>], iteration_bounds = array<i64: 2>, scalar_prefetch = 0 : i64, scratch_operands = 0 : i64, tpu.core_type = #tpu.core_type<tc>, window_params = [{transform_indices = @transform_0, window_bounds = array<i64: 2, 8, 128>}, {transform_indices = @transform_1, window_bounds = array<i64: 1>}, {transform_indices = @transform_2, window_bounds = array<i64: 1>}, {transform_indices = @transform_3, window_bounds = array<i64: 2, 8, 128>}]} {
    %c0 = arith.constant 0 : index
    %0 = memref.load %arg2[%c0] : memref<1xf32, #tpu.memory_space<smem>>
    %c0_0 = arith.constant 0 : index
    %1 = memref.load %arg3[%c0_0] : memref<1xf32, #tpu.memory_space<smem>>
    %c0_1 = arith.constant 0 : index
    %c0_2 = arith.constant 0 : index
    %c0_3 = arith.constant 0 : index
    %2 = vector.load %arg1[%c0_1, %c0_2, %c0_3] : memref<2x8x128xf32, #tpu.memory_space<vmem>>, vector<2x8x128xf32>
    %cst = arith.constant dense<0.000000e+00> : vector<2x8xf32>
    %3 = vector.multi_reduction <add>, %2, %cst [2] : vector<2x8x128xf32> to vector<2x8xf32>
    %4 = vector.shape_cast %3 : vector<2x8xf32> to vector<2x8x1xf32>
    %cst_4 = arith.constant 1.280000e+02 : f32
    %5 = vector.broadcast %cst_4 : f32 to vector<2x8x1xf32>
    %6 = arith.divf %4, %5 : vector<2x8x1xf32>
    %cst_5 = arith.constant dense<0.000000e+00> : vector<8x128xf32>
    %7 = vector.multi_reduction <add>, %2, %cst_5 [0] : vector<2x8x128xf32> to vector<8x128xf32>
    %8 = vector.shape_cast %7 : vector<8x128xf32> to vector<1x8x128xf32>
    %cst_6 = arith.constant 2.000000e+00 : f32
    %9 = vector.broadcast %cst_6 : f32 to vector<1x8x128xf32>
    %10 = arith.divf %8, %9 : vector<1x8x128xf32>
    %11 = vector.broadcast %10 : vector<1x8x128xf32> to vector<2x8x128xf32>
    %12 = arith.subf %2, %11 : vector<2x8x128xf32>
    %13 = arith.mulf %12, %12 : vector<2x8x128xf32>
    %cst_7 = arith.constant dense<0.000000e+00> : vector<8x128xf32>
    %14 = vector.multi_reduction <add>, %13, %cst_7 [0] : vector<2x8x128xf32> to vector<8x128xf32>
    %15 = vector.shape_cast %14 : vector<8x128xf32> to vector<1x8x128xf32>
    %cst_8 = arith.constant 1.000000e+00 : f32
    %16 = vector.broadcast %cst_8 : f32 to vector<1x8x128xf32>
    %17 = arith.mulf %15, %16 : vector<1x8x128xf32>
    %18 = math.sqrt %17 : vector<1x8x128xf32>
    %cst_9 = arith.constant 9.99999997E-7 : f32
    %19 = vector.broadcast %cst_9 : f32 to vector<1x8x128xf32>
    %20 = arith.addf %18, %19 : vector<1x8x128xf32>
    %cst_10 = arith.constant 1.000000e+00 : f32
    %21 = vector.broadcast %cst_10 : f32 to vector<1x8x128xf32>
    %22 = arith.divf %21, %20 : vector<1x8x128xf32>
    %23 = vector.broadcast %0 : f32 to vector<1x8x128xf32>
    %24 = arith.mulf %23, %22 : vector<1x8x128xf32>
    %25 = vector.broadcast %6 : vector<2x8x1xf32> to vector<2x8x128xf32>
    %26 = arith.subf %2, %25 : vector<2x8x128xf32>
    %27 = vector.broadcast %24 : vector<1x8x128xf32> to vector<2x8x128xf32>
    %28 = arith.mulf %26, %27 : vector<2x8x128xf32>
    %29 = vector.broadcast %1 : f32 to vector<2x8x128xf32>
    %30 = arith.addf %28, %29 : vector<2x8x128xf32>
    %c0_11 = arith.constant 0 : index
    %c0_12 = arith.constant 0 : index
    %c0_13 = arith.constant 0 : index
    %31 = vector.load %arg4[%c0_11, %c0_12, %c0_13] : memref<2x8x128xf32, #tpu.memory_space<vmem>>, vector<2x8x128xf32>
    tpu.vector_store %arg4[%c0_11, %c0_12, %c0_13], %30 {strides = array<i32>} : memref<2x8x128xf32, #tpu.memory_space<vmem>>, vector<2x8x128xf32>,
    return
  }
  func.func @transform_0(%arg0: i32) -> (i32, i32, i32) {
    %c0_i32 = arith.constant 0 : i32
    %c0_i32_0 = arith.constant 0 : i32
    %c0_i32_1 = arith.constant 0 : i32
    return %c0_i32, %arg0, %c0_i32_0 : i32, i32, i32
  }
  func.func @transform_1(%arg0: i32) -> i32 {
    %c0_i32 = arith.constant 0 : i32
    %c0_i32_0 = arith.constant 0 : i32
    return %c0_i32 : i32
  }
  func.func @transform_2(%arg0: i32) -> i32 {
    %c0_i32 = arith.constant 0 : i32
    %c0_i32_0 = arith.constant 0 : i32
    return %c0_i32 : i32
  }
  func.func @transform_3(%arg0: i32) -> (i32, i32, i32) {
    %c0_i32 = arith.constant 0 : i32
    %c0_i32_0 = arith.constant 0 : i32
    %c0_i32_1 = arith.constant 0 : i32
    return %c0_i32, %arg0, %c0_i32_0 : i32, i32, i32
  }
}

</mosaic_0001>

<bundles_post_ra>
// kernel: tpu_custom_call.1
= control target key start
LH: loop header
LB: loop body
LE: loop exit
PB: predicated region body
PF: predicated region fallthrough
CT: control target
= control target key end

     0   :  { %s672_s0 = inlined_call_operand.hbm [shape: f32[2,16,128], index: 0, kind: input, shape index: {}]   ;;  %s673_s1 = inlined_call_operand.<no memory space> [shape: f32[1], index: 1, kind: input, shape index: {}]   ;;  %s674_s2 = inlined_call_operand.<no memory space> [shape: f32[1], index: 2, kind: input, shape index: {}]   ;;  %s675_s3 = inlined_call_operand.hbm [shape: f32[2,16,128], index: 3, kind: output, shape index: {}]  }
   0x1   :  { %8 = sst [smem:[#allocation2]] %s673_s1 }
   0x2   :  { %9 = sst [smem:[#allocation3]] %s674_s2 }
   0x3   :  { %10 = vsyncpa [#allocation5], 0 }
   0x4   :  { %12 = vsyncpa [#allocation5 + $0x1], 0 }
   0x5   :  { %13 = vsyncpa [#allocation6], 0 }
   0x6   :  { %15 = vsyncpa [#allocation6 + $0x1], 0  ;;  %s512_s16 = smov 0   ;;  %s514_s17 = smov 0  }
   0x7   :  { %s516_s18 = smov 0   ;;  %s518_s19 = smov 0  }
   0x8 LB: > { %s533_s1 = sadd.s32 4294967295, %s476_s19   ;;  %s316_s2 = sadd.s32 4294967294, %s476_s19   ;;  %s476_s19 = sphi %s518_s19, %s691_s19   ;;  %s472_s18 = sphi %s516_s18, %s690_s18   ;;  %s468_s17 = sphi %s514_s17, %s689_s17   ;;  %s464_s16 = sphi %s512_s16, %s688_s16  }
   0x9   : > { %s537_s20 = sadd.s32 1, %s476_s19   ;;  %s28_s21 = sadd.s32 1, %s472_s18 }
   0xa   : > { %s25_s22 = ssub.s32 %s476_s19, %s537_s20  ;;  %p35_p0 = scmp.ne.s32.totalorder %s472_s18, %s468_s17 }
   0xb   : > { %p26_p1 = scmp.eq.s32.totalorder %s25_s22, 0  ;;  %p36_p2 = scmp.eq.s32.totalorder %s476_s19, 0 }
   0xc   : > { %p41_p3 = scmp.ne.s32.totalorder %s468_s17, %s464_s16  ;;  %p42_p4 = scmp.eq.s32.totalorder %s533_s1, 0 }
   0xd   : > { %s549_s23 = scalar_select %p26_p1, %s472_s18, %s28_s21  }
   0xe   : > { %p551_p5 = por %p36_p2, %p35_p0  ;;  %p555_p6 = por %p42_p4, %p41_p3 }
   0xf   : > { %p107_p7 = scmp.eq.s32.totalorder %s533_s1, 1  ;;  %p113_p8 = scmp.eq.s32.totalorder %s316_s2, 1 }
  0x10   : > { %s679_s25 = scalar_select %p555_p6, 1, 0 }
  0x11   : > { %p340_p10 = scmp.lt.s32.totalorder %s476_s19, 2  ;;  %p562_p11 = por %p107_p7, %p35_p0 }
  0x12   : > { %p566_p12 = por %p113_p8, %p41_p3  ;;  %s139_s28 = sand.u32 1, %s472_s18  }
  0x13   : > { %s680_s26 = scalar_select %p562_p11, 1, 0 }
  0x14   : > { %s681_s27 = scalar_select %p566_p12, 1, 0 }
  0x15   : > { %s320_s29 = sshll.u32 %s476_s19, 7  ;;  %s319_s30 = sshll.u32 %s139_s28, 4 }
  0x16   : > { %s575_s6 = scalar_lea.hbm %s672_s0, %s320_s29  ;;  %s143_s7 = scalar_lea.vmem [#allocation4], %s319_s30 }
  0x17   : > { %s149_s8 = sshll.u32 %s143_s7, 4  ;;  %p579_p13 = pnand %p340_p10, %p551_p5  ;;  %s583_s8 = int_to_ptr.vmem [resolvable:$true] %s149_s8 }
  0x18   : > { %s586_s10 = scalar_lea.sflag [#allocation5], %s139_s28  ;;  %s384_s11 = scalar_lea.hbm %s575_s6, 256 }
  0x19   : > { %p385_p1 = scmp.ne.s32.totalorder %s575_s6, %s384_s11  ;;  %p386_p2 = pneg %p579_p13 }
  0x1a   : > { %s389_s14 = scalar_lea.hbm %s672_s0, 512  ;;  %p390_p5 = scmp.lt.s32.totalorder %s575_s6, %s672_s0 }
  0x1b   : > { %p387_p3 = pnand %p386_p2, %p385_p1  ;;  %p391_p7 = scmp.lt.s32.totalorder %s389_s14, %s384_s11 }
  0x1d   : > { %p388_p4 = pneg %p387_p3  ;;  %p392_p8 = por %p391_p7, %p390_p5 }
  0x1f   : > { %p393_p10 = pnand %p392_p8, %p388_p4 }
  0x21   : > { %396 = shalt.err (!%p393_p10)
}
  0x22   : > { %s397_s21 = scalar_lea.vmem %s583_s8, 256  ;;  %s478_s22 = smov [#allocation4]  }
  0x23   : > { %p398_p9 = scmp.ne.s32.totalorder %s583_s8, %s397_s21  ;;  %s402_s24 = sshll.u32 %s478_s22, 4  ;;  %s403_s24 = int_to_ptr.vmem [resolvable:$false] %s402_s24 }
  0x24   : > { %s404_s28 = scalar_lea.vmem %s403_s24, 512  ;;  %p405_p3 = scmp.lt.s32.totalorder %s583_s8, %s403_s24 }
  0x25   : > { %p400_p0 = pnand %p398_p9, %p386_p2  ;;  %p406_p12 = scmp.lt.s32.totalorder %s404_s28, %s397_s21 }
  0x27   : > { %p401_p1 = pneg %p400_p0  ;;  %p407_p11 = por %p406_p12, %p405_p3 }
  0x29   : > { %p408_p6 = pnand %p407_p11, %p401_p1 }
  0x2b   : > { %411 = shalt.err (!%p408_p6)
}
  0x2c   : > { %s479_s29 = smov 256   ;;  %s480_s30 = smov 128  }
  0x2d   : > { %s481_s4 = smov 8   ;;  %p157_p9 = scmp.lt.s32.totalorder %s476_s19, 3 }
  0x2e   : > { %335 = dma.hbm_to_vmem [thread:$0]  (!%p579_p13), %s575_s6, 256, %s583_s8, %s586_s10, %s479_s29, %s480_s30, %s481_s4  }
  0x2f   : > { %p683_p0 = scmp.ge.s32.totalorder %s476_s19, 1 }
  0x31   : > { %p158_p2 = pnand %p683_p0, %p157_p9 }
  0x32   : > { %s611_s5 = sand.u32 (!%p158_p2), 1, %s468_s17   ;;  %p684_p6 = scmp.ne.s32.totalorder (!%p158_p2), %s679_s25, 0 }
  0x33   : > { %161 = sbr.rel (%p158_p2) target bundleno = 223 (0xdf), region = 32  ;;  %s322_s7 = sshll.u32 (!%p158_p2), %s611_s5, 4 }
  0x34   : > { %s164_s11 = scalar_lea.sflag (!%p158_p2), [#allocation5], %s611_s5  ;;  %s167_s12 = scalar_lea.vmem (!%p158_p2), [#allocation4], %s322_s7 }
  0x38   : > { %455 = dma.done.wait (%p684_p6), %s164_s11, 256  }
  0x39   : > { %457 = vsyncadd (%p684_p6), %s164_s11, 4294967040  ;;  %v192_v0 = vld [vmem:[%s167_s12] sm:$0xff]  ;;  %v193_v1 = vld [vmem:[%s167_s12 + $0x8] sm:$0xff]  ;;  %s190_s25 = sld [smem:[#allocation2]]  ;;  %s189_s8 = scalar_lea.vmem [#allocation7], %s322_s7 }
  0x3a   : > { %194 = vadd.xlane.f32.xlu0 %v192_v0  ;;  %v201_v2 = vadd.f32 %v193_v1, %v192_v0  ;;  %s191_s6 = sld [smem:[#allocation3]]  ;;  %s243_s9 = sshll.u32 %s189_s8, 4  ;;  %s624_s9 = int_to_ptr.vmem [resolvable:$true] %s243_s9 }
  0x3b   : > { %s325_s10 = sshll.u32 %s533_s1, 7  ;;  %s231_s2 = scalar_lea.sflag [#allocation6], %s611_s5 }
  0x3c   : > { %v203_v3 = vmul.f32 0.5, %v201_v2  ;;  %s629_s15 = scalar_lea.hbm %s675_s3, %s325_s10  ;;  %s412_s21 = scalar_lea.vmem %s624_s9, 256 }
  0x3d   : > { %p413_p11 = scmp.ne.s32.totalorder %s624_s9, %s412_s21  ;;  %p685_p12 = scmp.ne.s32.totalorder %s680_s26, 0 }
  0x3e   : > { %196 = vadd.xlane.f32.xlu0 %v193_v1  ;;  %v204_v4 = vsub.f32 %v192_v0, %v203_v3  ;;  %v205_v5 = vsub.f32 %v193_v1, %v203_v3  ;;  %s482_s1 = smov [#allocation7]  }
  0x3f   : > { %v219_v16 = vstv %s190_s25  ;;  %p414_p13 = pnand %p413_p11, %p685_p12  ;;  %s416_s22 = sshll.u32 %s482_s1, 4  ;;  %s417_s22 = int_to_ptr.vmem [resolvable:$false] %s416_s22 }
  0x40   : > { %v206_v6 = vmul.f32 %v204_v4, %v204_v4  ;;  %v207_v7 = vmul.f32 %v205_v5, %v205_v5  ;;  %v225_v21 = vstv %s191_s6  ;;  %s418_s24 = scalar_lea.vmem %s417_s22, 512  ;;  %p419_p5 = scmp.lt.s32.totalorder %s624_s9, %s417_s22 }
  0x41   : > { %p415_p4 = pneg %p414_p13  ;;  %p420_p7 = scmp.lt.s32.totalorder %s418_s24, %s412_s21 }
  0x42   : > { %v208_v8 = vadd.f32 %v207_v7, %v206_v6 }
  0x43   : > { %p421_p8 = por %p420_p7, %p419_p5 }
  0x44   : > { %380 = vrsqrt.f32 %v208_v8  ;;  %vm211_vm0 = vcmp.eq.f32.partialorder %v208_v8, inf  ;;  %v214_v11 = vand.u32 2147483648, %v208_v8  ;;  %vm213_vm1 = vcmp.eq.f32.partialorder %v208_v8, 0.0 }
  0x45   : > { %p422_p10 = pnand %p421_p8, %p415_p4 }
  0x51   : > { %v381_v9 = vpop.eup %380 }
  0x52   : > { %v210_v10 = vmul.f32 %v381_v9, %v208_v8 }
  0x54   : > { %v212_v12 = vsel %vm211_vm0, %v208_v8, %v210_v10 }
  0x55   : > { %v215_v13 = vsel %vm213_vm1, %v214_v11, %v212_v12 }
  0x56   : > { %v216_v14 = vadd.f32 1e-06, %v215_v13 }
  0x58   : > { %382 = vrcp.f32 %v216_v14 }
  0x65   : > { %v383_v15 = vpop.eup %382 }
  0x66   : > { %v220_v19 = vmul.f32 %v383_v15, %v219_v16 }
  0xc3   : > { %v195_v17 = vpop.xlane.xlu0 %194 }
  0xc4   : > { %v199_v18 = vmul.f32 0.0078125, %v195_v17 }
  0xc6   : > { %v221_v20 = vsub.f32 %v192_v0, %v199_v18 }
  0xc7   : > { %v197_v22 = vpop.xlane.xlu0 %196 }
  0xc8   : > { %v223_v23 = vmul.f32 %v221_v20, %v220_v19  ;;  %v200_v24 = vmul.f32 0.0078125, %v197_v22 }
  0xca   : > { %v226_v25 = vadd.f32 %v225_v21, %v223_v23  ;;  %v222_v26 = vsub.f32 %v193_v1, %v200_v24 }
  0xcc   : > { %228 = vst [vmem:[%s189_s8] sm:$0xff] %v226_v25  ;;  %v224_v27 = vmul.f32 %v222_v26, %v220_v19 }
  0xce   : > { %v227_v28 = vadd.f32 %v225_v21, %v224_v27 }
  0xd0   : > { %229 = vst [vmem:[%s189_s8 + $0x8] sm:$0xff] %v227_v28 }
  0xd1   : > { %425 = shalt.err (!%p422_p10)
}
  0xd2   : > { %s426_s28 = scalar_lea.hbm %s629_s15, 256  ;;  %s430_s4 = scalar_lea.hbm %s675_s3, 512 }
  0xd3   : > { %p427_p1 = scmp.ne.s32.totalorder %s629_s15, %s426_s28  ;;  %p431_p0 = scmp.lt.s32.totalorder %s629_s15, %s675_s3 }
  0xd4   : > { %p432_p2 = scmp.lt.s32.totalorder %s430_s4, %s426_s28 }
  0xd5   : > { %p428_p3 = pnand %p427_p1, %p685_p12 }
  0xd6   : > { %p433_p6 = por %p432_p2, %p431_p0 }
  0xd7   : > { %p429_p9 = pneg %p428_p3 }
  0xd9   : > { %p434_p11 = pnand %p433_p6, %p429_p9 }
  0xdb   : > { %437 = shalt.err (!%p434_p11)
}
  0xdc   : > { %s483_s12 = smov 128   ;;  %s484_s25 = smov 256  }
  0xdd   : > { %s485_s6 = smov 8  }
  0xde   : > { %330 = dma.vmem_to_hbm [thread:$0]  (%p685_p12), %s624_s9, 256, %s629_s15, %s231_s2, %s483_s12, %s484_s25, %s485_s6  }
  0xdf PF: > { %s258_s8 = sand.u32 1, %s464_s16   ;;  %p686_p13 = scmp.ne.s32.totalorder %s681_s27, 0 }
  0xe0   : > { %p687_p4 = scmp.ge.s32.totalorder %s476_s19, 2  ;;  %s259_s10 = scalar_lea.sflag [#allocation6], %s258_s8 }
  0xe2   : > { %p337_p5 = pnand %p687_p4, %p686_p13 }
  0xe4   : > { %p338_p7 = pneg %p337_p5 }
  0xe6   : > { %459 = dma.done.wait (%p338_p7), %s259_s10, 256  }
  0xe7   : > { %461 = vsyncadd (%p338_p7), %s259_s10, 4294967040  ;;  %p18_p8 = scmp.ge.s32.totalorder %s537_s20, 4   ;;  %s688_s16 = smov %s468_s17 }
  0xe8   : > { %s689_s17 = smov %s472_s18  ;;  %s690_s18 = smov %s549_s23 }
  0xe9   : > { %s691_s19 = smov %s537_s20  ;;  %20 = sbr.rel (!%p18_p8) target bundleno = 8 (0x8), region = 77 }
  0xee   :  { %264 = vsyncpa [#allocation5], 1 }
  0xef   :  { %266 = vsyncpa [#allocation5 + $0x1], 1 }
  0xf0   :  { %267 = vsyncpa [#allocation6], 1 }
  0xf1   :  { %269 = vsyncpa [#allocation6 + $0x1], 1 }

</bundles_post_ra>
